<compile_context>
chip_gen: v7x
topology: tpu7x:2x2x1
jax: 0.10.0
libtpu: 0.0.40
codegen_flags: <defaults>
</compile_context>

<pallas_src>
import jax
import jax.numpy as jnp
from jax import lax
from jax.experimental import pallas as pl
from jax.experimental.pallas import tpu as pltpu


BN_EPS = 1e-5
_LANE = 128
_VMEM_LIMIT = 48 * 1024 * 1024    # scoped-VMEM cap: headroom on v7x (64 MiB phys), fine on v5e/v6e
_VMEM_BUDGET = 40 * 1024 * 1024   # target working set for row-tile auto-shrink


def _round_up(x, m):
    return (x + m - 1) // m * m


def _pad2d(a, rows, cols):
    r, c = a.shape
    if r == rows and c == cols:
        return a
    return jnp.pad(a, ((0, rows - r), (0, cols - c)))


# ----------------------------- pass 1 -----------------------------
# h = x @ w1 (no bias: cancelled by BN) + per-tile partial column statistics.
# Partials are written per grid step (row 0 = sum, row 1 = sumsq of an (8, H) block)
# so the grid axis is fully parallel; the wrapper reduces across tiles.
def _make_mm1_stats_kernel(n_rows, tile):
    ragged = (n_rows % tile) != 0

    def kernel(x_ref, w1_ref, h_ref, stats_ref):
        h = jnp.dot(x_ref[...], w1_ref[...], preferred_element_type=jnp.float32)
        h_ref[...] = h.astype(h_ref.dtype)

        hm = h
        if ragged:
            # Mask rows beyond the true row count (only the last, partial tile has any).
            row0 = pl.program_id(0) * tile
            rows = row0 + lax.broadcasted_iota(jnp.int32, (tile, 1), 0)
            hm = jnp.where(rows < n_rows, h, 0.0)

        s = jnp.sum(hm, axis=0, keepdims=True)          # (1, H)
        ss = jnp.sum(hm * hm, axis=0, keepdims=True)    # (1, H)
        ridx = lax.broadcasted_iota(jnp.int32, (8, 1), 0)
        stats_ref[0] = jnp.where(ridx == 0, s, 0.0) + jnp.where(ridx == 1, ss, 0.0)

    return kernel


# ----------------------------- pass 2 -----------------------------
# out = relu(h * scale + shift) @ w2 + b2     (BN folded into one FMA)
def _bn_relu_mm2_kernel(h_ref, scale_ref, shift_ref, w2_ref, b2_ref, o_ref):
    h = h_ref[...].astype(jnp.float32)
    h = jnp.maximum(h * scale_ref[...] + shift_ref[...], 0.0)
    out = jnp.dot(h.astype(w2_ref.dtype), w2_ref[...],
                  preferred_element_type=jnp.float32) + b2_ref[...]
    o_ref[...] = out.astype(o_ref.dtype)


def prepare_params(params, *, compute_dtype=None, h_dtype=None):
    """One-time parameter prep (padding / dtype / layout), hoisted out of the per-call path.

    compute_dtype: optional dtype (e.g. jnp.bfloat16) for the MXU operands.
    h_dtype:       optional storage dtype for the N x inner intermediate (bf16 halves
                   the largest HBM stream at a small accuracy cost).
    """
    w1 = jnp.asarray(params["w1"])                       # [in, inner]
    w2 = jnp.asarray(params["w2"])                       # [inner, out]
    gamma = jnp.asarray(params["gamma"], jnp.float32).reshape(1, -1)
    beta = jnp.asarray(params["beta"], jnp.float32).reshape(1, -1)
    b2 = jnp.asarray(params["b2"], jnp.float32).reshape(1, -1)
    # params["b1"] is intentionally unused: exactly cancelled by training-mode BN.

    F, H = w1.shape
    O = w2.shape[1]
    F_p, H_p, O_p = (_round_up(d, _LANE) for d in (F, H, O))

    if compute_dtype is not None:
        w1 = w1.astype(compute_dtype)
        w2 = w2.astype(compute_dtype)

    return {
        "_prepared": True,
        "in_dim": F, "inner_dim": H, "out_dim": O,
        "w1": _pad2d(w1, F_p, H_p),
        "w2": _pad2d(w2, H_p, O_p),
        "gamma": _pad2d(gamma, 1, H_p),
        "beta": _pad2d(beta, 1, H_p),
        "b2": _pad2d(b2, 1, O_p),
        "compute_dtype": compute_dtype,
        "h_dtype": h_dtype,
    }


def _select_row_tile(row_tile, n_rows, f_p, h_p, o_p, x_isz, h_isz, w_isz, o_isz):
    tile = max(8, _round_up(min(row_tile, max(n_rows, 1)), 8))

    def est(t):
        # Conservative: everything (weights included) counted as double-buffered.
        p1 = (2 * t * f_p * x_isz + 2 * f_p * h_p * w_isz
              + 2 * t * h_p * h_isz + 2 * 8 * h_p * 4)
        p2 = (2 * t * h_p * h_isz + 2 * h_p * o_p * w_isz
              + 2 * t * o_p * o_isz + 4 * h_p * 4 + 2 * o_p * 4)
        return max(p1, p2)

    while tile > 64 and est(tile) > _VMEM_BUDGET:
        tile = max(64, _round_up(tile // 2, 8))
    return tile


def moby_mlp_forward(x, params, row_tile=512):
    """x: [B, S, in_dim] -> [B, S, out_dim]  (MoBYMLP, num_layers=2, training-mode BN)."""
    if not params.get("_prepared", False):
        params = prepare_params(params)

    B, S, F = x.shape
    N = B * S
    if F != params["in_dim"]:
        raise ValueError(f"x feature dim {F} != in_dim {params['in_dim']}")
    O = params["out_dim"]

    w1_p, w2_p = params["w1"], params["w2"]
    gamma_p, beta_p, b2_p = params["gamma"], params["beta"], params["b2"]
    F_p, H_p = w1_p.shape
    O_p = w2_p.shape[1]

    compute_dtype = params["compute_dtype"] or x.dtype
    h_dtype = params["h_dtype"] or compute_dtype
    out_dtype = x.dtype

    x2d = x.reshape(N, F).astype(compute_dtype)
    if F != F_p:
        # Lane padding only (zeros; w1's padded rows are zero so this is exact).
        # Row dimension is never padded: boundary tiles are masked in-kernel.
        x2d = jnp.pad(x2d, ((0, 0), (0, F_p - F)))

    tile = _select_row_tile(
        row_tile, N, F_p, H_p, O_p,
        jnp.dtype(x2d.dtype).itemsize, jnp.dtype(h_dtype).itemsize,
        jnp.dtype(w1_p.dtype).itemsize, jnp.dtype(out_dtype).itemsize)
    n_tiles = pl.cdiv(N, tile)

    # ---- pass 1: matmul1 + per-tile partial column statistics (fully parallel) ----
    h_p, stats = pl.pallas_call(
        _make_mm1_stats_kernel(N, tile),
        out_shape=(
            jax.ShapeDtypeStruct((N, H_p), h_dtype),
            jax.ShapeDtypeStruct((n_tiles, 8, H_p), jnp.float32),
        ),
        grid_spec=pltpu.PrefetchScalarGridSpec(
            num_scalar_prefetch=0,
            grid=(n_tiles,),
            in_specs=[
                pl.BlockSpec((tile, F_p), lambda i: (i, 0)),
                pl.BlockSpec((F_p, H_p), lambda i: (0, 0)),     # resident weight
            ],
            out_specs=(
                pl.BlockSpec((tile, H_p), lambda i: (i, 0)),
                pl.BlockSpec((1, 8, H_p), lambda i: (i, 0, 0)),  # per-tile partials
            ),
        ),
        compiler_params=pltpu.CompilerParams(
            dimension_semantics=("parallel",),
            vmem_limit_bytes=_VMEM_LIMIT,
        ),
    )(x2d, w1_p)

    # Fold training-mode BatchNorm1d into a single scale/shift (tiny cross-tile reduce).
    # Padded columns have gamma=0 -> scale=0, shift=0; masked rows contribute 0.
    col_sum = jnp.sum(stats[:, 0, :], axis=0, keepdims=True)
    col_sumsq = jnp.sum(stats[:, 1, :], axis=0, keepdims=True)
    inv_n = jnp.float32(1.0 / N)
    mean = col_sum * inv_n
    var = jnp.maximum(col_sumsq * inv_n - mean * mean, 0.0)     # biased variance
    scale = gamma_p * lax.rsqrt(var + BN_EPS)
    shift = beta_p - mean * scale

    # ---- pass 2: BN affine + ReLU + matmul2 (independent row tiles -> parallel) ----
    out_p = pl.pallas_call(
        _bn_relu_mm2_kernel,
        out_shape=jax.ShapeDtypeStruct((N, O_p), out_dtype),
        grid_spec=pltpu.PrefetchScalarGridSpec(
            num_scalar_prefetch=0,
            grid=(n_tiles,),
            in_specs=[
                pl.BlockSpec((tile, H_p), lambda i: (i, 0)),
                pl.BlockSpec((1, H_p), lambda i: (0, 0)),        # scale (resident)
                pl.BlockSpec((1, H_p), lambda i: (0, 0)),        # shift (resident)
                pl.BlockSpec((H_p, O_p), lambda i: (0, 0)),      # w2    (resident)
                pl.BlockSpec((1, O_p), lambda i: (0, 0)),        # b2    (resident)
            ],
            out_specs=pl.BlockSpec((tile, O_p), lambda i: (i, 0)),
        ),
        compiler_params=pltpu.CompilerParams(
            dimension_semantics=("parallel",),
            vmem_limit_bytes=_VMEM_LIMIT,
        ),
    )(h_p, scale, shift, w2_p, b2_p)

    return out_p[:, :O].reshape(B, S, O)


def init_params(key, in_dim, inner_dim, out_dim):
    """Deterministic synthetic init matching nn.Linear / nn.BatchNorm1d shapes."""
    k1, k2, k3, k4 = jax.random.split(key, 4)
    bound1 = 1.0 / (in_dim ** 0.5)
    bound2 = 1.0 / (inner_dim ** 0.5)
    return {
        # PyTorch Linear weight is [out, in]; stored transposed here as [in, out].
        "w1": jax.random.uniform(k1, (in_dim, inner_dim), jnp.float32, -bound1, bound1),
        "b1": jax.random.uniform(k2, (1, inner_dim), jnp.float32, -bound1, bound1),
        "gamma": jnp.ones((1, inner_dim), jnp.float32),
        "beta": jnp.zeros((1, inner_dim), jnp.float32),
        "w2": jax.random.uniform(k3, (inner_dim, out_dim), jnp.float32, -bound2, bound2),
        "b2": jax.random.uniform(k4, (1, out_dim), jnp.float32, -bound2, bound2),
    }


def moby_mlp_reference(x, params):
    """Pure-JAX reference with the full PyTorch semantics (including b1, which the
    kernel drops because training-mode BN's mean subtraction cancels it exactly)."""
    B, S, F = x.shape
    h = x.reshape(B * S, F) @ params["w1"] + params["b1"]
    mean = jnp.mean(h, axis=0, keepdims=True)
    var = jnp.mean((h - mean) ** 2, axis=0, keepdims=True)   # biased
    h = (h - mean) / jnp.sqrt(var + BN_EPS)
    h = h * params["gamma"] + params["beta"]
    h = jnp.maximum(h, 0.0)
    out = h @ params["w2"] + params["b2"]
    return out.reshape(B, S, -1)


if __name__ == "__main__":
    # Small shapes consistent with the module's forward ([B, S, in_dim]).
    B, S = 2, 8
    in_dim, inner_dim, out_dim = 32, 64, 32

    key = jax.random.PRNGKey(0)
    kx, kp, kx2 = jax.random.split(key, 3)
    x = jax.random.normal(kx, (B, S, in_dim), jnp.float32)
    raw_params = init_params(kp, in_dim, inner_dim, out_dim)

    # One-time parameter prep (padding / layout) hoisted out of the per-call path.
    prepared = prepare_params(raw_params)
    fwd = jax.jit(lambda xx: moby_mlp_forward(xx, prepared))

    out = jax.block_until_ready(fwd(x))
    ref = moby_mlp_reference(x, raw_params)
    assert out.shape == (B, S, out_dim)
    assert jnp.allclose(out, ref, atol=1e-4, rtol=1e-4), "mismatch vs reference"

    # Ragged row count (B*S not a multiple of 8 / the row tile): exercises the
    # in-kernel boundary-tile masking path (no row padding of x).
    B2, S2 = 3, 5
    x2 = jax.random.normal(kx2, (B2, S2, in_dim), jnp.float32)
    out2 = jax.block_until_ready(jax.jit(lambda xx: moby_mlp_forward(xx, prepared))(x2))
    ref2 = moby_mlp_reference(x2, raw_params)
    assert out2.shape == (B2, S2, out_dim)
    assert jnp.allclose(out2, ref2, atol=1e-4, rtol=1e-4), "ragged mismatch vs reference"

    print("KERNEL_OK")
</pallas_src>

<mosaic_0001>
module attributes {stable_mosaic.version = 11 : i64} {
  func.func @_bn_relu_mm2_kernel(%arg0: i32, %arg1: memref<16x128xf32, #tpu.memory_space<vmem>>, %arg2: memref<1x128xf32, #tpu.memory_space<vmem>>, %arg3: memref<1x128xf32, #tpu.memory_space<vmem>>, %arg4: memref<128x128xf32, #tpu.memory_space<vmem>>, %arg5: memref<1x128xf32, #tpu.memory_space<vmem>>, %arg6: memref<16x128xf32, #tpu.memory_space<vmem>>) attributes {dimension_semantics = [#tpu.dimension_semantics<parallel>], iteration_bounds = array<i64: 1>, scalar_prefetch = 0 : i64, scratch_operands = 0 : i64, tpu.core_type = #tpu.core_type<tc>, window_params = [{transform_indices = @transform_0, window_bounds = array<i64: 16, 128>}, {pipeline_mode = #tpu.pipeline_mode<synchronous>, transform_indices = @transform_1, window_bounds = array<i64: 1, 128>}, {pipeline_mode = #tpu.pipeline_mode<synchronous>, transform_indices = @transform_2, window_bounds = array<i64: 1, 128>}, {pipeline_mode = #tpu.pipeline_mode<synchronous>, transform_indices = @transform_3, window_bounds = array<i64: 128, 128>}, {pipeline_mode = #tpu.pipeline_mode<synchronous>, transform_indices = @transform_4, window_bounds = array<i64: 1, 128>}, {transform_indices = @transform_5, window_bounds = array<i64: 16, 128>}]} {
    %c0 = arith.constant 0 : index
    %c0_0 = arith.constant 0 : index
    %0 = vector.load %arg1[%c0, %c0_0] : memref<16x128xf32, #tpu.memory_space<vmem>>, vector<16x128xf32>
    %c0_1 = arith.constant 0 : index
    %c0_2 = arith.constant 0 : index
    %1 = vector.load %arg2[%c0_1, %c0_2] : memref<1x128xf32, #tpu.memory_space<vmem>>, vector<1x128xf32>
    %2 = vector.broadcast %1 : vector<1x128xf32> to vector<16x128xf32>
    %3 = arith.mulf %0, %2 : vector<16x128xf32>
    %c0_3 = arith.constant 0 : index
    %c0_4 = arith.constant 0 : index
    %4 = vector.load %arg3[%c0_3, %c0_4] : memref<1x128xf32, #tpu.memory_space<vmem>>, vector<1x128xf32>
    %5 = vector.broadcast %4 : vector<1x128xf32> to vector<16x128xf32>
    %6 = arith.addf %3, %5 : vector<16x128xf32>
    %cst = arith.constant 0.000000e+00 : f32
    %7 = vector.broadcast %cst : f32 to vector<16x128xf32>
    %8 = arith.maximumf %6, %7 : vector<16x128xf32>
    %c0_5 = arith.constant 0 : index
    %c0_6 = arith.constant 0 : index
    %9 = vector.load %arg4[%c0_5, %c0_6] : memref<128x128xf32, #tpu.memory_space<vmem>>, vector<128x128xf32>
    %cst_7 = arith.constant dense<0.000000e+00> : vector<16x128xf32>
    %10 = tpu.matmul %8, %9, %cst_7 {dimension_numbers = #tpu.dot_dimension_numbers<[1], [0], [0], [1], [0, 0, 1, 1], [], []>} : vector<16x128xf32>, vector<128x128xf32>, vector<16x128xf32> -> vector<16x128xf32>
    %c0_8 = arith.constant 0 : index
    %c0_9 = arith.constant 0 : index
    %11 = vector.load %arg5[%c0_8, %c0_9] : memref<1x128xf32, #tpu.memory_space<vmem>>, vector<1x128xf32>
    %12 = vector.broadcast %11 : vector<1x128xf32> to vector<16x128xf32>
    %13 = arith.addf %10, %12 : vector<16x128xf32>
    %c0_10 = arith.constant 0 : index
    %c0_11 = arith.constant 0 : index
    %14 = vector.load %arg6[%c0_10, %c0_11] : memref<16x128xf32, #tpu.memory_space<vmem>>, vector<16x128xf32>
    tpu.vector_store %arg6[%c0_10, %c0_11], %13 {strides = array<i32>} : memref<16x128xf32, #tpu.memory_space<vmem>>, vector<16x128xf32>,
    return
  }
  func.func @transform_0(%arg0: i32) -> (i32, i32) {
    %c0_i32 = arith.constant 0 : i32
    %c0_i32_0 = arith.constant 0 : i32
    return %arg0, %c0_i32 : i32, i32
  }
  func.func @transform_1(%arg0: i32) -> (i32, i32) {
    %c0_i32 = arith.constant 0 : i32
    %c0_i32_0 = arith.constant 0 : i32
    %c0_i32_1 = arith.constant 0 : i32
    return %c0_i32, %c0_i32_0 : i32, i32
  }
  func.func @transform_2(%arg0: i32) -> (i32, i32) {
    %c0_i32 = arith.constant 0 : i32
    %c0_i32_0 = arith.constant 0 : i32
    %c0_i32_1 = arith.constant 0 : i32
    return %c0_i32, %c0_i32_0 : i32, i32
  }
  func.func @transform_3(%arg0: i32) -> (i32, i32) {
    %c0_i32 = arith.constant 0 : i32
    %c0_i32_0 = arith.constant 0 : i32
    %c0_i32_1 = arith.constant 0 : i32
    return %c0_i32, %c0_i32_0 : i32, i32
  }
  func.func @transform_4(%arg0: i32) -> (i32, i32) {
    %c0_i32 = arith.constant 0 : i32
    %c0_i32_0 = arith.constant 0 : i32
    %c0_i32_1 = arith.constant 0 : i32
    return %c0_i32, %c0_i32_0 : i32, i32
  }
  func.func @transform_5(%arg0: i32) -> (i32, i32) {
    %c0_i32 = arith.constant 0 : i32
    %c0_i32_0 = arith.constant 0 : i32
    return %arg0, %c0_i32 : i32, i32
  }
}

module attributes {stable_mosaic.version = 11 : i64} {
  func.func @kernel(%arg0: i32, %arg1: memref<16x128xf32, #tpu.memory_space<vmem>>, %arg2: memref<128x128xf32, #tpu.memory_space<vmem>>, %arg3: memref<16x128xf32, #tpu.memory_space<vmem>>, %arg4: memref<1x8x128xf32, #tpu.memory_space<vmem>>) attributes {dimension_semantics = [#tpu.dimension_semantics<parallel>], iteration_bounds = array<i64: 1>, scalar_prefetch = 0 : i64, scratch_operands = 0 : i64, tpu.core_type = #tpu.core_type<tc>, window_params = [{transform_indices = @transform_0, window_bounds = array<i64: 16, 128>}, {pipeline_mode = #tpu.pipeline_mode<synchronous>, transform_indices = @transform_1, window_bounds = array<i64: 128, 128>}, {transform_indices = @transform_2, window_bounds = array<i64: 16, 128>}, {transform_indices = @transform_3, window_bounds = array<i64: 1, 8, 128>}]} {
    %c0 = arith.constant 0 : index
    %c0_0 = arith.constant 0 : index
    %0 = vector.load %arg1[%c0, %c0_0] : memref<16x128xf32, #tpu.memory_space<vmem>>, vector<16x128xf32>
    %c0_1 = arith.constant 0 : index
    %c0_2 = arith.constant 0 : index
    %1 = vector.load %arg2[%c0_1, %c0_2] : memref<128x128xf32, #tpu.memory_space<vmem>>, vector<128x128xf32>
    %cst = arith.constant dense<0.000000e+00> : vector<16x128xf32>
    %2 = tpu.matmul %0, %1, %cst {dimension_numbers = #tpu.dot_dimension_numbers<[1], [0], [0], [1], [0, 0, 1, 1], [], []>} : vector<16x128xf32>, vector<128x128xf32>, vector<16x128xf32> -> vector<16x128xf32>
    %c0_3 = arith.constant 0 : index
    %c0_4 = arith.constant 0 : index
    %3 = vector.load %arg3[%c0_3, %c0_4] : memref<16x128xf32, #tpu.memory_space<vmem>>, vector<16x128xf32>
    tpu.vector_store %arg3[%c0_3, %c0_4], %2 {strides = array<i32>} : memref<16x128xf32, #tpu.memory_space<vmem>>, vector<16x128xf32>,
    %cst_5 = arith.constant dense<0.000000e+00> : vector<128xf32>
    %4 = vector.multi_reduction <add>, %2, %cst_5 [0] : vector<16x128xf32> to vector<128xf32>
    %5 = vector.shape_cast %4 : vector<128xf32> to vector<1x128xf32>
    %6 = arith.mulf %2, %2 : vector<16x128xf32>
    %cst_6 = arith.constant dense<0.000000e+00> : vector<128xf32>
    %7 = vector.multi_reduction <add>, %6, %cst_6 [0] : vector<16x128xf32> to vector<128xf32>
    %8 = vector.shape_cast %7 : vector<128xf32> to vector<1x128xf32>
    %9 = tpu.iota {dimensions = array<i32: 0>} : vector<8x1xi32>
    %c0_i32 = arith.constant 0 : i32
    %10 = vector.broadcast %c0_i32 : i32 to vector<8x1xi32>
    %11 = arith.cmpi eq, %9, %10 : vector<8x1xi32>
    %cst_7 = arith.constant 0.000000e+00 : f32
    %12 = vector.shape_cast %11 : vector<8x1xi1> to vector<8x1xi1>
    %13 = vector.broadcast %12 : vector<8x1xi1> to vector<8x128xi1>
    %14 = vector.shape_cast %5 : vector<1x128xf32> to vector<1x128xf32>
    %15 = vector.broadcast %14 : vector<1x128xf32> to vector<8x128xf32>
    %16 = vector.broadcast %cst_7 : f32 to vector<8x128xf32>
    %17 = arith.select %13, %15, %16 : vector<8x128xi1>, vector<8x128xf32>
    %c1_i32 = arith.constant 1 : i32
    %18 = vector.broadcast %c1_i32 : i32 to vector<8x1xi32>
    %19 = arith.cmpi eq, %9, %18 : vector<8x1xi32>
    %cst_8 = arith.constant 0.000000e+00 : f32
    %20 = vector.shape_cast %19 : vector<8x1xi1> to vector<8x1xi1>
    %21 = vector.broadcast %20 : vector<8x1xi1> to vector<8x128xi1>
    %22 = vector.shape_cast %8 : vector<1x128xf32> to vector<1x128xf32>
    %23 = vector.broadcast %22 : vector<1x128xf32> to vector<8x128xf32>
    %24 = vector.broadcast %cst_8 : f32 to vector<8x128xf32>
    %25 = arith.select %21, %23, %24 : vector<8x128xi1>, vector<8x128xf32>
    %26 = arith.addf %17, %25 : vector<8x128xf32>
    %c0_9 = arith.constant 0 : index
    %c0_10 = arith.constant 0 : index
    %c0_11 = arith.constant 0 : index
    %27 = vector.load %arg4[%c0_9, %c0_10, %c0_11] : memref<1x8x128xf32, #tpu.memory_space<vmem>>, vector<1x8x128xf32>
    %28 = vector.shape_cast %27 : vector<1x8x128xf32> to vector<8x128xf32>
    %29 = vector.shape_cast %26 : vector<8x128xf32> to vector<1x8x128xf32>
    tpu.vector_store %arg4[%c0_9, %c0_10, %c0_11], %29 {strides = array<i32>} : memref<1x8x128xf32, #tpu.memory_space<vmem>>, vector<1x8x128xf32>,
    return
  }
  func.func @transform_0(%arg0: i32) -> (i32, i32) {
    %c0_i32 = arith.constant 0 : i32
    %c0_i32_0 = arith.constant 0 : i32
    return %arg0, %c0_i32 : i32, i32
  }
  func.func @transform_1(%arg0: i32) -> (i32, i32) {
    %c0_i32 = arith.constant 0 : i32
    %c0_i32_0 = arith.constant 0 : i32
    %c0_i32_1 = arith.constant 0 : i32
    return %c0_i32, %c0_i32_0 : i32, i32
  }
  func.func @transform_2(%arg0: i32) -> (i32, i32) {
    %c0_i32 = arith.constant 0 : i32
    %c0_i32_0 = arith.constant 0 : i32
    return %arg0, %c0_i32 : i32, i32
  }
  func.func @transform_3(%arg0: i32) -> (i32, i32, i32) {
    %c0_i32 = arith.constant 0 : i32
    %c0_i32_0 = arith.constant 0 : i32
    %c0_i32_1 = arith.constant 0 : i32
    return %arg0, %c0_i32, %c0_i32_0 : i32, i32, i32
  }
}

</mosaic_0001>

<bundles_post_ra>
// kernel: _lambda_.2
= control target key start
LH: loop header
LB: loop body
LE: loop exit
PB: predicated region body
PF: predicated region fallthrough
CT: control target
= control target key end

     0   :  { %9 = vsyncpa [#allocation3], 0  ;;  %s271_s12 = smov [#allocation2]   ;;  %s321_s0 = inlined_call_operand.vmem [shape: f32[16,128], index: 0, kind: input, shape index: {}]   ;;  %s322_s1 = inlined_call_operand.hbm [shape: f32[128,128], index: 1, kind: input, shape index: {}]   ;;  %s323_s2 = inlined_call_operand.vmem [shape: f32[16,128], index: 2, kind: output, shape index: {0}]   ;;  %s324_s3 = inlined_call_operand.vmem [shape: f32[1,8,128], index: 3, kind: output, shape index: {1}]  }
   0x1   :  { %s17_s13 = sshll.u32 %s271_s12, 4  ;;  %s247_s16 = scalar_lea.hbm %s322_s1, 2048  ;;  %s18_s13 = int_to_ptr.vmem [resolvable:$true] %s17_s13 }
   0x2   :  { %p248_p0 = scmp.ne.s32.totalorder %s322_s1, %s247_s16  ;;  %p251_p1 = scmp.lt.u32.totalorder %s247_s16, %s322_s1 }
   0x4   :  { %p253_p2 = pnand %p251_p1, %p248_p0 }
   0x6   :  { %256 = shalt.err (!%p253_p2)
}
   0x7   :  { %s257_s21 = scalar_lea.vmem %s18_s13, 2048  ;;  %p262_p4 = scmp.lt.s32.totalorder %s18_s13, %s18_s13 }
   0x8   :  { %p258_p3 = scmp.ne.s32.totalorder %s18_s13, %s257_s21  ;;  %p263_p5 = scmp.lt.s32.totalorder %s257_s21, %s257_s21 }
   0xa   :  { %p264_p6 = por %p263_p5, %p262_p4 }
   0xc   :  { %p265_p7 = pnand %p264_p6, %p258_p3 }
   0xe   :  { %268 = shalt.err (!%p265_p7)
}
   0xf   :  { %s272_s22 = smov 128   ;;  %s273_s23 = smov 8  }
  0x10   :  { %23 = dma.hbm_to_vmem [thread:$0]  %s322_s1, 2048, %s18_s13, [#allocation3], %s272_s22, %s272_s22, %s273_s23  }
  0x11   :  { %269 = dma.done.wait [#allocation3], 2048  }
  0x12   :  { %270 = vsyncadd [#allocation3], 4294965248  ;;  %v29_v0 = vld [vmem:[#allocation2] sm:$0xff]  ;;  %v30_v1 = vld [vmem:[#allocation2 + $0x8] sm:$0xff]  ;;  %v138_v35 = vlaneseq }
  0x13   :  { %v31_v2 = vld [vmem:[#allocation2 + $0x10] sm:$0xff]  ;;  %v212_v3 = vpack.c.bf16 %v30_v1, %v29_v0  ;;  %v32_v4 = vld [vmem:[#allocation2 + $0x18] sm:$0xff]  ;;  %v33_v6 = vld [vmem:[#allocation2 + $0x20] sm:$0xff] }
  0x14   :  { %v216_v5 = vpack.c.bf16 %v32_v4, %v31_v2  ;;  %v34_v7 = vld [vmem:[#allocation2 + $0x28] sm:$0xff]  ;;  %v27_v9 = vld [vmem:[%s321_s0] sm:$0xff]  ;;  %v35_v10 = vld [vmem:[#allocation2 + $0x30] sm:$0xff]  ;;  %v139_v40 = vshrl.u32 %v138_v35, 7 }
  0x15   :  { %213 = vmatprep.subr.bf16.mxu0 %v212_v3  ;;  %v220_v8 = vpack.c.bf16 %v34_v7, %v33_v6  ;;  %v36_v11 = vld [vmem:[#allocation2 + $0x38] sm:$0xff]  ;;  %209 = vmatprep.mubr.f32.mxu0 %v27_v9  ;;  %v37_v13 = vld [vmem:[#allocation2 + $0x40] sm:$0xff]  ;;  %v38_v14 = vld [vmem:[#allocation2 + $0x48] sm:$0xff] }
  0x16   :  { %215 = vmatpush3.bf16.msra.mxu0 %v212_v3  ;;  %v224_v12 = vpack.c.bf16 %v36_v11, %v35_v10  ;;  %v228_v15 = vpack.c.bf16 %v38_v14, %v37_v13  ;;  %v39_v16 = vld [vmem:[#allocation2 + $0x50] sm:$0xff]  ;;  %v40_v17 = vld [vmem:[#allocation2 + $0x58] sm:$0xff]  ;;  %v41_v19 = vld [vmem:[#allocation2 + $0x60] sm:$0xff]  ;;  %vm140_vm0 = vcmp.eq.s32.totalorder %v139_v40, 0  ;;  %vm144_vm1 = vcmp.eq.s32.totalorder %v139_v40, 1 }
  0x17   :  { %217 = vmatprep.subr.bf16.mxu0 %v216_v5  ;;  %v232_v18 = vpack.c.bf16 %v40_v17, %v39_v16  ;;  %v42_v20 = vld [vmem:[#allocation2 + $0x68] sm:$0xff]  ;;  %v43_v22 = vld [vmem:[#allocation2 + $0x70] sm:$0xff]  ;;  %v44_v23 = vld [vmem:[#allocation2 + $0x78] sm:$0xff] }
  0x18   :  { %v236_v21 = vpack.c.bf16 %v42_v20, %v41_v19  ;;  %v240_v24 = vpack.c.bf16 %v44_v23, %v43_v22  ;;  %v28_v25 = vld [vmem:[%s321_s0 + $0x8] sm:$0xff] }
  0x1a   :  { %219 = vmatpush3.bf16.msra.mxu0 %v216_v5 }
  0x1b   :  { %221 = vmatprep.subr.bf16.mxu0 %v220_v8 }
  0x1e   :  { %223 = vmatpush3.bf16.msra.mxu0 %v220_v8 }
  0x1f   :  { %225 = vmatprep.subr.bf16.mxu0 %v224_v12 }
  0x22   :  { %227 = vmatpush3.bf16.msra.mxu0 %v224_v12 }
  0x23   :  { %229 = vmatprep.subr.bf16.mxu0 %v228_v15 }
  0x26   :  { %231 = vmatpush3.bf16.msra.mxu0 %v228_v15 }
  0x27   :  { %233 = vmatprep.subr.bf16.mxu0 %v232_v18 }
  0x2a   :  { %235 = vmatpush3.bf16.msra.mxu0 %v232_v18 }
  0x2b   :  { %237 = vmatprep.subr.bf16.mxu0 %v236_v21 }
  0x2e   :  { %239 = vmatpush3.bf16.msra.mxu0 %v236_v21 }
  0x2f   :  { %241 = vmatprep.subr.bf16.mxu0 %v240_v24 }
  0x32   :  { %243 = vmatpush3.bf16.msra.mxu0 %v240_v24 }
  0x35   :  { %210 = vmatmul.mubr.f32.vlgmr.msra.gmra.mrb[0].mxu0 %v28_v25 }
 0x108   :  { %v211_v26 = vpop.f32.mrb[0].mxu0 }
 0x109   :  { %121 = vst [vmem:[%s323_s2 + $0x8] sm:$0xff] %v211_v26  ;;  %v130_v27 = vmul.f32 %v211_v26, %v211_v26  ;;  %v111_v28 = vpop.f32.mrb[1].mxu0 }
 0x10a   :  { %120 = vst [vmem:[%s323_s2] sm:$0xff] %v111_v28  ;;  %v122_v29 = vadd.f32 %v211_v26, %v111_v28  ;;  %v129_v30 = vmul.f32 %v111_v28, %v111_v28 }
 0x10c   :  { %v123_v31 = vrot.slane %v122_v29, 4  ;;  %v131_v32 = vadd.f32 %v130_v27, %v129_v30 }
 0x10e   :  { %v124_v33 = vadd.f32 %v123_v31, %v122_v29  ;;  %v132_v34 = vrot.slane %v131_v32, 4 }
 0x110   :  { %v125_v36 = vrot.slane %v124_v33, 2  ;;  %v133_v37 = vadd.f32 %v132_v34, %v131_v32 }
 0x112   :  { %v126_v38 = vadd.f32 %v125_v36, %v124_v33  ;;  %v134_v39 = vrot.slane %v133_v37, 2 }
 0x114   :  { %v127_v41 = vrot.slane %v126_v38, 1  ;;  %v135_v42 = vadd.f32 %v134_v39, %v133_v37 }
 0x116   :  { %v128_v43 = vadd.f32 %v127_v41, %v126_v38  ;;  %v136_v44 = vrot.slane %v135_v42, 1 }
 0x118   :  { %v137_v45 = vadd.f32 %v136_v44, %v135_v42  ;;  %v143_v46 = vsel %vm140_vm0, %v128_v43, 0.0 }
 0x11a   :  { %v147_v47 = vsel %vm144_vm1, %v137_v45, 0.0 }
 0x11b   :  { %v148_v48 = vadd.f32 %v147_v47, %v143_v46 }
 0x11d   :  { %149 = vst [vmem:[%s324_s3] sm:$0xff] %v148_v48 }
 0x11e   :  { %158 = vsyncpa [#allocation3], 1 }

// kernel: _lambda_.3
= control target key start
LH: loop header
LB: loop body
LE: loop exit
PB: predicated region body
PF: predicated region fallthrough
CT: control target
= control target key end

     0   :  { %s333_s3 = inlined_call_operand.vmem [shape: f32[128,128], index: 3, kind: input, shape index: {}]   ;;  %s334_s0 = inlined_call_operand.vmem [shape: f32[16,128], index: 0, kind: input, shape index: {}]   ;;  %s335_s1 = inlined_call_operand.vmem [shape: f32[1,128], index: 1, kind: input, shape index: {}]   ;;  %s336_s2 = inlined_call_operand.vmem [shape: f32[1,128], index: 2, kind: input, shape index: {}]   ;;  %s337_s4 = inlined_call_operand.vmem [shape: f32[1,128], index: 4, kind: input, shape index: {}]   ;;  %s338_s5 = inlined_call_operand.vmem [shape: f32[16,128], index: 5, kind: output, shape index: {}]  }
   0x1   :  { %v42_v0 = vld [vmem:[%s333_s3] sm:$0xff]  ;;  %v43_v1 = vld [vmem:[%s333_s3 + $0x8] sm:$0xff]  ;;  %v44_v2 = vld [vmem:[%s333_s3 + $0x10] sm:$0xff] }
   0x2   :  { %v202_v3 = vpack.c.bf16 %v43_v1, %v42_v0  ;;  %v45_v4 = vld [vmem:[%s333_s3 + $0x18] sm:$0xff]  ;;  %v46_v6 = vld [vmem:[%s333_s3 + $0x20] sm:$0xff]  ;;  %v47_v7 = vld [vmem:[%s333_s3 + $0x28] sm:$0xff] }
   0x3   :  { %v206_v5 = vpack.c.bf16 %v45_v4, %v44_v2  ;;  %v210_v8 = vpack.c.bf16 %v47_v7, %v46_v6  ;;  %v48_v9 = vld [vmem:[%s333_s3 + $0x30] sm:$0xff]  ;;  %v20_v10 = vld [vmem:[%s334_s0] sm:$0xff]  ;;  %v49_v11 = vld [vmem:[%s333_s3 + $0x38] sm:$0xff] }
   0x4   :  { %203 = vmatprep.subr.bf16.mxu0 %v202_v3  ;;  %v146_v12 = vld [vmem:[%s335_s1] ss:$0 sm:$0xff]  ;;  %v214_v15 = vpack.c.bf16 %v49_v11, %v48_v9  ;;  %v51_v18 = vld [vmem:[%s333_s3 + $0x48] sm:$0xff]  ;;  %v52_v21 = vld [vmem:[%s333_s3 + $0x50] sm:$0xff] }
   0x5   :  { %205 = vmatpush3.bf16.msra.mxu0 %v202_v3  ;;  %v147_v13 = vld [vmem:[%s336_s2] ss:$0 sm:$0xff]  ;;  %v29_v14 = vmul.f32 %v146_v12, %v20_v10  ;;  %v53_v22 = vld [vmem:[%s333_s3 + $0x58] sm:$0xff]  ;;  %v55_v25 = vld [vmem:[%s333_s3 + $0x68] sm:$0xff] }
   0x6   :  { %207 = vmatprep.subr.bf16.mxu0 %v206_v5  ;;  %v50_v17 = vld [vmem:[%s333_s3 + $0x40] sm:$0xff]  ;;  %v222_v23 = vpack.c.bf16 %v53_v22, %v52_v21  ;;  %v21_v26 = vld [vmem:[%s334_s0 + $0x8] sm:$0xff]  ;;  %v56_v28 = vld [vmem:[%s333_s3 + $0x70] sm:$0xff] }
   0x7   :  { %v38_v16 = vadd.f32 %v147_v13, %v29_v14  ;;  %v218_v20 = vpack.c.bf16 %v51_v18, %v50_v17  ;;  %v54_v24 = vld [vmem:[%s333_s3 + $0x60] sm:$0xff]  ;;  %v57_v29 = vld [vmem:[%s333_s3 + $0x78] sm:$0xff]  ;;  %v30_v30 = vmul.f32 %v146_v12, %v21_v26 }
   0x8   :  { %v226_v27 = vpack.c.bf16 %v55_v25, %v54_v24  ;;  %v230_v31 = vpack.c.bf16 %v57_v29, %v56_v28  ;;  %v148_v34 = vld [vmem:[%s337_s4] ss:$0 sm:$0xff] }
   0x9   :  { %209 = vmatpush3.bf16.msra.mxu0 %v206_v5  ;;  %v40_v19 = vmax.f32 %v38_v16, 0.0  ;;  %v39_v32 = vadd.f32 %v147_v13, %v30_v30 }
   0xa   :  { %211 = vmatprep.subr.bf16.mxu0 %v210_v8 }
   0xb   :  { %199 = vmatprep.mubr.f32.mxu0 %v40_v19  ;;  %v41_v33 = vmax.f32 %v39_v32, 0.0 }
   0xd   :  { %213 = vmatpush3.bf16.msra.mxu0 %v210_v8 }
   0xe   :  { %215 = vmatprep.subr.bf16.mxu0 %v214_v15 }
  0x11   :  { %217 = vmatpush3.bf16.msra.mxu0 %v214_v15 }
  0x12   :  { %219 = vmatprep.subr.bf16.mxu0 %v218_v20 }
  0x15   :  { %221 = vmatpush3.bf16.msra.mxu0 %v218_v20 }
  0x16   :  { %223 = vmatprep.subr.bf16.mxu0 %v222_v23 }
  0x19   :  { %225 = vmatpush3.bf16.msra.mxu0 %v222_v23 }
  0x1a   :  { %227 = vmatprep.subr.bf16.mxu0 %v226_v27 }
  0x1d   :  { %229 = vmatpush3.bf16.msra.mxu0 %v226_v27 }
  0x1e   :  { %231 = vmatprep.subr.bf16.mxu0 %v230_v31 }
  0x21   :  { %233 = vmatpush3.bf16.msra.mxu0 %v230_v31 }
  0x24   :  { %200 = vmatmul.mubr.f32.vlgmr.msra.gmra.mrb[0].mxu0 %v41_v33 }
  0xf7   :  { %v201_v35 = vpop.f32.mrb[0].mxu0 }
  0xf8   :  { %v137_v36 = vadd.f32 %v201_v35, %v148_v34  ;;  %v131_v37 = vpop.f32.mrb[1].mxu0 }
  0xf9   :  { %v132_v38 = vadd.f32 %v148_v34, %v131_v37 }
  0xfa   :  { %141 = vst [vmem:[%s338_s5 + $0x8] sm:$0xff] %v137_v36 }
  0xfb   :  { %140 = vst [vmem:[%s338_s5] sm:$0xff] %v132_v38 }

</bundles_post_ra>
